<compile_context>
chip_gen: v6e
topology: v6e:2x2x1
jax: 0.10.0
libtpu: 0.0.40
codegen_flags: <defaults>
</compile_context>

<pallas_src>
import functools

import jax
import jax.numpy as jnp
import numpy as np
from jax import lax
from jax.experimental import pallas as pl
from jax.experimental.pallas import tpu as pltpu


def _round_up(x: int, m: int) -> int:
    return (x + m - 1) // m * m


def convblock_kernel(xph_ref, w_ref, b_ref, o_ref, *, KH, KW, Wph, OUT_W):
    """Fused conv + bias + ReLU + 2x2/2 max-pool for one image.

    xph_ref: (1, 4, Cin_p, IN_W) bf16 -- pool-phase planes of the input:
             xph[0, p*2+q, c, i*Wph + j] = x[c, 2i+p, 2j+q]; lanes are the
             flattened (padded) pooled grid, zero-padded out to IN_W.
    w_ref:   (KH*KW, Cout, Cin_p) bf16 -- one (Cout, Cin_p) matrix per tap.
    b_ref:   (Cout, 1) f32 -- conv bias.
    o_ref:   (1, Cout, OUT_W) f32 -- pooled output, lane-dense.
    """
    cout = o_ref.shape[1]

    # Accumulate the conv over its KH*KW taps.  For each tap, one MXU issue
    # covers all four 2x2-pool offsets: the four statically shifted views of
    # the phase planes are lane-concatenated (128-aligned chunks) into one
    # rhs.  bf16 MXU inputs, f32 accumulation.
    # TODO(synk): fully fusing the KH*KW taps into a single (Cout, K) x
    # (K, 4*OUT_W) dot needs a sublane concat of the shifted views; kept as
    # an accumulation loop for lowering robustness (MXU is idle here anyway).
    acc = jnp.zeros((cout, 4 * OUT_W), jnp.float32)
    for kh in range(KH):
        for kw in range(KW):
            wk = w_ref[kh * KW + kw]                        # (Cout, Cin_p)
            chunks = []
            for a in (0, 1):                                # pool row offset
                for b in (0, 1):                            # pool col offset
                    s, t = a + kh, b + kw
                    phase = (s % 2) * 2 + (t % 2)
                    off = (s // 2) * Wph + (t // 2)         # static lane shift
                    chunks.append(xph_ref[0, phase, :, off:off + OUT_W])
            rhs = jnp.concatenate(chunks, axis=-1)          # (Cin_p, 4*OUT_W)
            acc = acc + jnp.dot(wk, rhs, preferred_element_type=jnp.float32)

    # 2x2/2 max pool = max over the four pool-offset lane chunks.  Bias and
    # ReLU applied once afterwards (both commute with max).  All f32 (v5e has
    # no bf16 VPU path).
    y = jnp.maximum(
        jnp.maximum(acc[:, 0 * OUT_W:1 * OUT_W], acc[:, 1 * OUT_W:2 * OUT_W]),
        jnp.maximum(acc[:, 2 * OUT_W:3 * OUT_W], acc[:, 3 * OUT_W:4 * OUT_W]))
    y = jnp.maximum(y + b_ref[...], 0.0)
    o_ref[0] = y.astype(o_ref.dtype)


def conv_block_forward(x_nchw, weight_oihw, bias, *, batch_norm=False, dropout=0.0):
    """ConvBlock.forward: Conv2d(stride 1, VALID) -> ReLU -> MaxPool2d(2, 2)."""
    if batch_norm:
        raise NotImplementedError("ConvBlock(batch_norm=True) not implemented")
    if dropout:
        raise NotImplementedError("ConvBlock(dropout>0) not implemented")
    # TODO(synk): only the default activation (ReLU) is supported; a
    # non-monotone activation would not commute with the in-kernel pool max.

    N, Cin, H, W = x_nchw.shape
    Cout, _, KH, KW = weight_oihw.shape
    Ho, Wo = H - KH + 1, W - KW + 1
    Hp, Wp = Ho // 2, Wo // 2                   # MaxPool2d(2,2) floor semantics
    assert Hp >= 1 and Wp >= 1, "input too small for conv + 2x2 pool"

    # Pool-phase geometry: conv+pool at pooled position (ph, pw), pool offset
    # (a, b), tap (kh, kw) reads x[2ph+a+kh, 2pw+b+kw]
    #   = phase plane ((a+kh)%2, (b+kw)%2) at (ph + (a+kh)//2, pw + (b+kw)//2)
    # i.e. a static shift of at most (KH//2, KW//2) on the pooled grid.
    sh, sw = KH // 2, KW // 2
    Hph, Wph = Hp + sh, Wp + sw                 # phase-plane extent incl. shift slack
    HW = Hph * Wph                              # flattened pooled grid per image
    Cin_p = _round_up(Cin, 16)                  # bf16 sublane tile on the K axis
    OUT_W = _round_up(HW, 128)                  # lane-dense output width per image
    IN_W = _round_up(OUT_W + sh * Wph + sw, 128)

    # ---- wrapper-side layout glue (1:1 relayout, no KH*KW expansion) ----
    # Cast to bf16 *before* any relayout so every XLA copy moves half the bytes.
    x = x_nchw.astype(jnp.bfloat16)
    pad_h = max(0, 2 * Hph - H)
    pad_w = max(0, 2 * Wph - W)
    x = jnp.pad(x, ((0, 0), (0, Cin_p - Cin), (0, pad_h), (0, pad_w)))
    x = x[:, :, :2 * Hph, :2 * Wph]
    x = x.reshape(N, Cin_p, Hph, 2, Wph, 2)
    # -> (N, p, q, Cin_p, Hph, Wph) -> (N, 4, Cin_p, HW), zero-padded on lanes.
    xph = jnp.transpose(x, (0, 3, 5, 1, 2, 4)).reshape(N, 4, Cin_p, HW)
    xph = jnp.pad(xph, ((0, 0), (0, 0), (0, 0), (0, IN_W - HW)))

    # Weights: (Cout, Cin, KH, KW) -> (KH*KW, Cout, Cin_p) bf16 (tiny, resident).
    w = jnp.transpose(weight_oihw, (2, 3, 0, 1)).reshape(KH * KW, Cout, Cin)
    w = jnp.pad(w, ((0, 0), (0, 0), (0, Cin_p - Cin))).astype(jnp.bfloat16)
    b2d = bias.reshape(Cout, 1).astype(jnp.float32)

    # ---- VMEM budget (tightest chip: v7x, 64 MiB phys / 32 MiB scoped) ----
    in_block = 4 * Cin_p * IN_W * 2             # per-image bf16 phase planes
    out_block = Cout * OUT_W * 4                # per-image f32 output block
    resident = KH * KW * Cout * Cin_p * 2 + Cout * 4
    temps = 4 * Cout * OUT_W * 4 + 2 * (4 * Cin_p * OUT_W * 2)  # acc + rhs/chunks
    vmem_needed = 2 * (in_block + out_block + resident) + temps
    vmem_limit = int(min(48 * 1024 * 1024, max(16 * 1024 * 1024, 2 * vmem_needed)))

    cost = pl.CostEstimate(
        flops=2 * N * KH * KW * Cout * Cin_p * 4 * OUT_W,
        transcendentals=0,
        bytes_accessed=N * in_block + resident + N * out_block,
    )

    kernel = functools.partial(convblock_kernel, KH=KH, KW=KW, Wph=Wph, OUT_W=OUT_W)

    # TODO(synk): for very large images, block the phase planes over row slabs
    # instead of keeping a whole image resident per grid step.
    out = pl.pallas_call(
        kernel,
        out_shape=jax.ShapeDtypeStruct((N, Cout, OUT_W), jnp.float32),
        grid=(N,),
        in_specs=[
            pl.BlockSpec((1, 4, Cin_p, IN_W), lambda n: (n, 0, 0, 0)),
            pl.BlockSpec((KH * KW, Cout, Cin_p), lambda n: (0, 0, 0)),
            pl.BlockSpec((Cout, 1), lambda n: (0, 0)),
        ],
        out_specs=pl.BlockSpec((1, Cout, OUT_W), lambda n: (n, 0, 0)),
        compiler_params=pltpu.CompilerParams(
            dimension_semantics=("parallel",),   # v7x: split batch across 2 TCs
            vmem_limit_bytes=vmem_limit,
        ),
        cost_estimate=cost,
    )(xph, w, b2d)

    # Drop lane padding and the shift-slack rows/cols of the pooled grid.
    out = out[:, :, :HW].reshape(N, Cout, Hph, Wph)[:, :, :Hp, :Wp]
    return out                                   # NCHW (N, Cout, Hp, Wp)


def reference_forward(x_nchw, weight_oihw, bias):
    y = lax.conv_general_dilated(
        x_nchw, weight_oihw, window_strides=(1, 1), padding="VALID",
        dimension_numbers=("NCHW", "OIHW", "NCHW"))
    y = y + bias[None, :, None, None]
    y = jnp.maximum(y, 0.0)
    y = lax.reduce_window(y, -jnp.inf, lax.max,
                          (1, 1, 2, 2), (1, 1, 2, 2), "VALID")
    return y


if __name__ == "__main__":
    key = jax.random.PRNGKey(0)
    kx, kw, kb = jax.random.split(key, 3)

    # ConvBlock(in_channels=4, out_channels=8, kernel_size=3), NCHW input.
    N, Cin, H, W = 2, 4, 16, 16
    Cout, KH, KW = 8, 3, 3

    x = jax.random.normal(kx, (N, Cin, H, W), dtype=jnp.float32)
    # Deterministic PyTorch-style (kaiming-uniform bound) init, synthetic.
    fan_in = Cin * KH * KW
    bound = 1.0 / np.sqrt(fan_in)
    weight = jax.random.uniform(kw, (Cout, Cin, KH, KW), jnp.float32, -bound, bound)
    bias = jax.random.uniform(kb, (Cout,), jnp.float32, -bound, bound)

    out = jax.block_until_ready(conv_block_forward(x, weight, bias))
    assert out.shape == (N, Cout, (H - KH + 1) // 2, (W - KW + 1) // 2)

    # Tight check: same math on bf16-rounded MXU inputs (isolates kernel logic).
    x_bf = x.astype(jnp.bfloat16).astype(jnp.float32)
    w_bf = weight.astype(jnp.bfloat16).astype(jnp.float32)
    ref_bf = jax.block_until_ready(reference_forward(x_bf, w_bf, bias))
    np.testing.assert_allclose(np.asarray(out), np.asarray(ref_bf),
                               rtol=2e-3, atol=2e-3)

    # End-to-end check vs. full f32 reference (tolerance reflects bf16 inputs).
    ref = jax.block_until_ready(reference_forward(x, weight, bias))
    np.testing.assert_allclose(np.asarray(out), np.asarray(ref),
                               rtol=3e-2, atol=3e-2)

    print("KERNEL_OK")
</pallas_src>

<mosaic_0001>
module attributes {stable_mosaic.version = 11 : i64} {
  func.func @convblock_kernel(%arg0: i32, %arg1: memref<1x4x16x256xbf16, #tpu.memory_space<vmem>>, %arg2: memref<9x8x16xbf16, #tpu.memory_space<vmem>>, %arg3: memref<8x1xf32, #tpu.memory_space<vmem>>, %arg4: memref<1x8x128xf32, #tpu.memory_space<vmem>>) attributes {dimension_semantics = [#tpu.dimension_semantics<parallel>], iteration_bounds = array<i64: 2>, scalar_prefetch = 0 : i64, scratch_operands = 0 : i64, tpu.core_type = #tpu.core_type<tc>, window_params = [{transform_indices = @transform_0, window_bounds = array<i64: 1, 4, 16, 256>}, {pipeline_mode = #tpu.pipeline_mode<synchronous>, transform_indices = @transform_1, window_bounds = array<i64: 9, 8, 16>}, {pipeline_mode = #tpu.pipeline_mode<synchronous>, transform_indices = @transform_2, window_bounds = array<i64: 8, 1>}, {transform_indices = @transform_3, window_bounds = array<i64: 1, 8, 128>}]} {
    %cst = arith.constant 0.000000e+00 : f32
    %0 = vector.broadcast %cst : f32 to vector<8x512xf32>
    %c0 = arith.constant 0 : index
    %c0_0 = arith.constant 0 : index
    %c0_1 = arith.constant 0 : index
    %1 = vector.load %arg2[%c0, %c0_0, %c0_1] : memref<9x8x16xbf16, #tpu.memory_space<vmem>>, vector<1x8x16xbf16>
    %2 = vector.shape_cast %1 : vector<1x8x16xbf16> to vector<8x16xbf16>
    %c0_2 = arith.constant 0 : index
    %c0_3 = arith.constant 0 : index
    %c0_4 = arith.constant 0 : index
    %c0_5 = arith.constant 0 : index
    %3 = vector.load %arg1[%c0_2, %c0_3, %c0_4, %c0_5] : memref<1x4x16x256xbf16, #tpu.memory_space<vmem>>, vector<1x1x16x128xbf16>
    %4 = vector.shape_cast %3 : vector<1x1x16x128xbf16> to vector<16x128xbf16>
    %c0_6 = arith.constant 0 : index
    %c1 = arith.constant 1 : index
    %c0_7 = arith.constant 0 : index
    %c0_8 = arith.constant 0 : index
    %5 = vector.load %arg1[%c0_6, %c1, %c0_7, %c0_8] : memref<1x4x16x256xbf16, #tpu.memory_space<vmem>>, vector<1x1x16x128xbf16>
    %6 = vector.shape_cast %5 : vector<1x1x16x128xbf16> to vector<16x128xbf16>
    %c0_9 = arith.constant 0 : index
    %c2 = arith.constant 2 : index
    %c0_10 = arith.constant 0 : index
    %c0_11 = arith.constant 0 : index
    %7 = vector.load %arg1[%c0_9, %c2, %c0_10, %c0_11] : memref<1x4x16x256xbf16, #tpu.memory_space<vmem>>, vector<1x1x16x128xbf16>
    %8 = vector.shape_cast %7 : vector<1x1x16x128xbf16> to vector<16x128xbf16>
    %c0_12 = arith.constant 0 : index
    %c3 = arith.constant 3 : index
    %c0_13 = arith.constant 0 : index
    %c0_14 = arith.constant 0 : index
    %9 = vector.load %arg1[%c0_12, %c3, %c0_13, %c0_14] : memref<1x4x16x256xbf16, #tpu.memory_space<vmem>>, vector<1x1x16x128xbf16>
    %10 = vector.shape_cast %9 : vector<1x1x16x128xbf16> to vector<16x128xbf16>
    %11 = tpu.concatenate %4, %6, %8, %10 in 1 : vector<16x128xbf16>, vector<16x128xbf16>, vector<16x128xbf16>, vector<16x128xbf16> -> vector<16x512xbf16>
    %cst_15 = arith.constant dense<0.000000e+00> : vector<8x512xf32>
    %12 = tpu.matmul %2, %11, %cst_15 {dimension_numbers = #tpu.dot_dimension_numbers<[1], [0], [0], [1], [0, 0, 1, 1], [], []>} : vector<8x16xbf16>, vector<16x512xbf16>, vector<8x512xf32> -> vector<8x512xf32>
    %13 = arith.addf %0, %12 : vector<8x512xf32>
    %c1_16 = arith.constant 1 : index
    %c0_17 = arith.constant 0 : index
    %c0_18 = arith.constant 0 : index
    %14 = vector.load %arg2[%c1_16, %c0_17, %c0_18] : memref<9x8x16xbf16, #tpu.memory_space<vmem>>, vector<1x8x16xbf16>
    %15 = vector.shape_cast %14 : vector<1x8x16xbf16> to vector<8x16xbf16>
    %c0_19 = arith.constant 0 : index
    %c1_20 = arith.constant 1 : index
    %c0_21 = arith.constant 0 : index
    %c0_22 = arith.constant 0 : index
    %16 = vector.load %arg1[%c0_19, %c1_20, %c0_21, %c0_22] : memref<1x4x16x256xbf16, #tpu.memory_space<vmem>>, vector<1x1x16x128xbf16>
    %17 = vector.shape_cast %16 : vector<1x1x16x128xbf16> to vector<16x128xbf16>
    %c0_23 = arith.constant 0 : index
    %c0_24 = arith.constant 0 : index
    %c0_25 = arith.constant 0 : index
    %c1_26 = arith.constant 1 : index
    %18 = vector.load %arg1[%c0_23, %c0_24, %c0_25, %c1_26] : memref<1x4x16x256xbf16, #tpu.memory_space<vmem>>, vector<1x1x16x128xbf16>
    %19 = vector.shape_cast %18 : vector<1x1x16x128xbf16> to vector<16x128xbf16>
    %c0_27 = arith.constant 0 : index
    %c3_28 = arith.constant 3 : index
    %c0_29 = arith.constant 0 : index
    %c0_30 = arith.constant 0 : index
    %20 = vector.load %arg1[%c0_27, %c3_28, %c0_29, %c0_30] : memref<1x4x16x256xbf16, #tpu.memory_space<vmem>>, vector<1x1x16x128xbf16>
    %21 = vector.shape_cast %20 : vector<1x1x16x128xbf16> to vector<16x128xbf16>
    %c0_31 = arith.constant 0 : index
    %c2_32 = arith.constant 2 : index
    %c0_33 = arith.constant 0 : index
    %c1_34 = arith.constant 1 : index
    %22 = vector.load %arg1[%c0_31, %c2_32, %c0_33, %c1_34] : memref<1x4x16x256xbf16, #tpu.memory_space<vmem>>, vector<1x1x16x128xbf16>
    %23 = vector.shape_cast %22 : vector<1x1x16x128xbf16> to vector<16x128xbf16>
    %24 = tpu.concatenate %17, %19, %21, %23 in 1 : vector<16x128xbf16>, vector<16x128xbf16>, vector<16x128xbf16>, vector<16x128xbf16> -> vector<16x512xbf16>
    %cst_35 = arith.constant dense<0.000000e+00> : vector<8x512xf32>
    %25 = tpu.matmul %15, %24, %cst_35 {dimension_numbers = #tpu.dot_dimension_numbers<[1], [0], [0], [1], [0, 0, 1, 1], [], []>} : vector<8x16xbf16>, vector<16x512xbf16>, vector<8x512xf32> -> vector<8x512xf32>
    %26 = arith.addf %13, %25 : vector<8x512xf32>
    %c2_36 = arith.constant 2 : index
    %c0_37 = arith.constant 0 : index
    %c0_38 = arith.constant 0 : index
    %27 = vector.load %arg2[%c2_36, %c0_37, %c0_38] : memref<9x8x16xbf16, #tpu.memory_space<vmem>>, vector<1x8x16xbf16>
    %28 = vector.shape_cast %27 : vector<1x8x16xbf16> to vector<8x16xbf16>
    %c0_39 = arith.constant 0 : index
    %c0_40 = arith.constant 0 : index
    %c0_41 = arith.constant 0 : index
    %c1_42 = arith.constant 1 : index
    %29 = vector.load %arg1[%c0_39, %c0_40, %c0_41, %c1_42] : memref<1x4x16x256xbf16, #tpu.memory_space<vmem>>, vector<1x1x16x128xbf16>
    %30 = vector.shape_cast %29 : vector<1x1x16x128xbf16> to vector<16x128xbf16>
    %c0_43 = arith.constant 0 : index
    %c1_44 = arith.constant 1 : index
    %c0_45 = arith.constant 0 : index
    %c1_46 = arith.constant 1 : index
    %31 = vector.load %arg1[%c0_43, %c1_44, %c0_45, %c1_46] : memref<1x4x16x256xbf16, #tpu.memory_space<vmem>>, vector<1x1x16x128xbf16>
    %32 = vector.shape_cast %31 : vector<1x1x16x128xbf16> to vector<16x128xbf16>
    %c0_47 = arith.constant 0 : index
    %c2_48 = arith.constant 2 : index
    %c0_49 = arith.constant 0 : index
    %c1_50 = arith.constant 1 : index
    %33 = vector.load %arg1[%c0_47, %c2_48, %c0_49, %c1_50] : memref<1x4x16x256xbf16, #tpu.memory_space<vmem>>, vector<1x1x16x128xbf16>
    %34 = vector.shape_cast %33 : vector<1x1x16x128xbf16> to vector<16x128xbf16>
    %c0_51 = arith.constant 0 : index
    %c3_52 = arith.constant 3 : index
    %c0_53 = arith.constant 0 : index
    %c1_54 = arith.constant 1 : index
    %35 = vector.load %arg1[%c0_51, %c3_52, %c0_53, %c1_54] : memref<1x4x16x256xbf16, #tpu.memory_space<vmem>>, vector<1x1x16x128xbf16>
    %36 = vector.shape_cast %35 : vector<1x1x16x128xbf16> to vector<16x128xbf16>
    %37 = tpu.concatenate %30, %32, %34, %36 in 1 : vector<16x128xbf16>, vector<16x128xbf16>, vector<16x128xbf16>, vector<16x128xbf16> -> vector<16x512xbf16>
    %cst_55 = arith.constant dense<0.000000e+00> : vector<8x512xf32>
    %38 = tpu.matmul %28, %37, %cst_55 {dimension_numbers = #tpu.dot_dimension_numbers<[1], [0], [0], [1], [0, 0, 1, 1], [], []>} : vector<8x16xbf16>, vector<16x512xbf16>, vector<8x512xf32> -> vector<8x512xf32>
    %39 = arith.addf %26, %38 : vector<8x512xf32>
    %c3_56 = arith.constant 3 : index
    %c0_57 = arith.constant 0 : index
    %c0_58 = arith.constant 0 : index
    %40 = vector.load %arg2[%c3_56, %c0_57, %c0_58] : memref<9x8x16xbf16, #tpu.memory_space<vmem>>, vector<1x8x16xbf16>
    %41 = vector.shape_cast %40 : vector<1x8x16xbf16> to vector<8x16xbf16>
    %c0_59 = arith.constant 0 : index
    %c2_60 = arith.constant 2 : index
    %c0_61 = arith.constant 0 : index
    %c0_62 = arith.constant 0 : index
    %42 = vector.load %arg1[%c0_59, %c2_60, %c0_61, %c0_62] : memref<1x4x16x256xbf16, #tpu.memory_space<vmem>>, vector<1x1x16x128xbf16>
    %43 = vector.shape_cast %42 : vector<1x1x16x128xbf16> to vector<16x128xbf16>
    %c0_63 = arith.constant 0 : index
    %c3_64 = arith.constant 3 : index
    %c0_65 = arith.constant 0 : index
    %c0_66 = arith.constant 0 : index
    %44 = vector.load %arg1[%c0_63, %c3_64, %c0_65, %c0_66] : memref<1x4x16x256xbf16, #tpu.memory_space<vmem>>, vector<1x1x16x128xbf16>
    %45 = vector.shape_cast %44 : vector<1x1x16x128xbf16> to vector<16x128xbf16>
    %c0_67 = arith.constant 0 : index
    %c0_68 = arith.constant 0 : index
    %c0_69 = arith.constant 0 : index
    %c8 = arith.constant 8 : index
    %46 = vector.load %arg1[%c0_67, %c0_68, %c0_69, %c8] : memref<1x4x16x256xbf16, #tpu.memory_space<vmem>>, vector<1x1x16x128xbf16>
    %47 = vector.shape_cast %46 : vector<1x1x16x128xbf16> to vector<16x128xbf16>
    %c0_70 = arith.constant 0 : index
    %c1_71 = arith.constant 1 : index
    %c0_72 = arith.constant 0 : index
    %c8_73 = arith.constant 8 : index
    %48 = vector.load %arg1[%c0_70, %c1_71, %c0_72, %c8_73] : memref<1x4x16x256xbf16, #tpu.memory_space<vmem>>, vector<1x1x16x128xbf16>
    %49 = vector.shape_cast %48 : vector<1x1x16x128xbf16> to vector<16x128xbf16>
    %50 = tpu.concatenate %43, %45, %47, %49 in 1 : vector<16x128xbf16>, vector<16x128xbf16>, vector<16x128xbf16>, vector<16x128xbf16> -> vector<16x512xbf16>
    %cst_74 = arith.constant dense<0.000000e+00> : vector<8x512xf32>
    %51 = tpu.matmul %41, %50, %cst_74 {dimension_numbers = #tpu.dot_dimension_numbers<[1], [0], [0], [1], [0, 0, 1, 1], [], []>} : vector<8x16xbf16>, vector<16x512xbf16>, vector<8x512xf32> -> vector<8x512xf32>
    %52 = arith.addf %39, %51 : vector<8x512xf32>
    %c4 = arith.constant 4 : index
    %c0_75 = arith.constant 0 : index
    %c0_76 = arith.constant 0 : index
    %53 = vector.load %arg2[%c4, %c0_75, %c0_76] : memref<9x8x16xbf16, #tpu.memory_space<vmem>>, vector<1x8x16xbf16>
    %54 = vector.shape_cast %53 : vector<1x8x16xbf16> to vector<8x16xbf16>
    %c0_77 = arith.constant 0 : index
    %c3_78 = arith.constant 3 : index
    %c0_79 = arith.constant 0 : index
    %c0_80 = arith.constant 0 : index
    %55 = vector.load %arg1[%c0_77, %c3_78, %c0_79, %c0_80] : memref<1x4x16x256xbf16, #tpu.memory_space<vmem>>, vector<1x1x16x128xbf16>
    %56 = vector.shape_cast %55 : vector<1x1x16x128xbf16> to vector<16x128xbf16>
    %c0_81 = arith.constant 0 : index
    %c2_82 = arith.constant 2 : index
    %c0_83 = arith.constant 0 : index
    %c1_84 = arith.constant 1 : index
    %57 = vector.load %arg1[%c0_81, %c2_82, %c0_83, %c1_84] : memref<1x4x16x256xbf16, #tpu.memory_space<vmem>>, vector<1x1x16x128xbf16>
    %58 = vector.shape_cast %57 : vector<1x1x16x128xbf16> to vector<16x128xbf16>
    %c0_85 = arith.constant 0 : index
    %c1_86 = arith.constant 1 : index
    %c0_87 = arith.constant 0 : index
    %c8_88 = arith.constant 8 : index
    %59 = vector.load %arg1[%c0_85, %c1_86, %c0_87, %c8_88] : memref<1x4x16x256xbf16, #tpu.memory_space<vmem>>, vector<1x1x16x128xbf16>
    %60 = vector.shape_cast %59 : vector<1x1x16x128xbf16> to vector<16x128xbf16>
    %c0_89 = arith.constant 0 : index
    %c0_90 = arith.constant 0 : index
    %c0_91 = arith.constant 0 : index
    %c9 = arith.constant 9 : index
    %61 = vector.load %arg1[%c0_89, %c0_90, %c0_91, %c9] : memref<1x4x16x256xbf16, #tpu.memory_space<vmem>>, vector<1x1x16x128xbf16>
    %62 = vector.shape_cast %61 : vector<1x1x16x128xbf16> to vector<16x128xbf16>
    %63 = tpu.concatenate %56, %58, %60, %62 in 1 : vector<16x128xbf16>, vector<16x128xbf16>, vector<16x128xbf16>, vector<16x128xbf16> -> vector<16x512xbf16>
    %cst_92 = arith.constant dense<0.000000e+00> : vector<8x512xf32>
    %64 = tpu.matmul %54, %63, %cst_92 {dimension_numbers = #tpu.dot_dimension_numbers<[1], [0], [0], [1], [0, 0, 1, 1], [], []>} : vector<8x16xbf16>, vector<16x512xbf16>, vector<8x512xf32> -> vector<8x512xf32>
    %65 = arith.addf %52, %64 : vector<8x512xf32>
    %c5 = arith.constant 5 : index
    %c0_93 = arith.constant 0 : index
    %c0_94 = arith.constant 0 : index
    %66 = vector.load %arg2[%c5, %c0_93, %c0_94] : memref<9x8x16xbf16, #tpu.memory_space<vmem>>, vector<1x8x16xbf16>
    %67 = vector.shape_cast %66 : vector<1x8x16xbf16> to vector<8x16xbf16>
    %c0_95 = arith.constant 0 : index
    %c2_96 = arith.constant 2 : index
    %c0_97 = arith.constant 0 : index
    %c1_98 = arith.constant 1 : index
    %68 = vector.load %arg1[%c0_95, %c2_96, %c0_97, %c1_98] : memref<1x4x16x256xbf16, #tpu.memory_space<vmem>>, vector<1x1x16x128xbf16>
    %69 = vector.shape_cast %68 : vector<1x1x16x128xbf16> to vector<16x128xbf16>
    %c0_99 = arith.constant 0 : index
    %c3_100 = arith.constant 3 : index
    %c0_101 = arith.constant 0 : index
    %c1_102 = arith.constant 1 : index
    %70 = vector.load %arg1[%c0_99, %c3_100, %c0_101, %c1_102] : memref<1x4x16x256xbf16, #tpu.memory_space<vmem>>, vector<1x1x16x128xbf16>
    %71 = vector.shape_cast %70 : vector<1x1x16x128xbf16> to vector<16x128xbf16>
    %c0_103 = arith.constant 0 : index
    %c0_104 = arith.constant 0 : index
    %c0_105 = arith.constant 0 : index
    %c9_106 = arith.constant 9 : index
    %72 = vector.load %arg1[%c0_103, %c0_104, %c0_105, %c9_106] : memref<1x4x16x256xbf16, #tpu.memory_space<vmem>>, vector<1x1x16x128xbf16>
    %73 = vector.shape_cast %72 : vector<1x1x16x128xbf16> to vector<16x128xbf16>
    %c0_107 = arith.constant 0 : index
    %c1_108 = arith.constant 1 : index
    %c0_109 = arith.constant 0 : index
    %c9_110 = arith.constant 9 : index
    %74 = vector.load %arg1[%c0_107, %c1_108, %c0_109, %c9_110] : memref<1x4x16x256xbf16, #tpu.memory_space<vmem>>, vector<1x1x16x128xbf16>
    %75 = vector.shape_cast %74 : vector<1x1x16x128xbf16> to vector<16x128xbf16>
    %76 = tpu.concatenate %69, %71, %73, %75 in 1 : vector<16x128xbf16>, vector<16x128xbf16>, vector<16x128xbf16>, vector<16x128xbf16> -> vector<16x512xbf16>
    %cst_111 = arith.constant dense<0.000000e+00> : vector<8x512xf32>
    %77 = tpu.matmul %67, %76, %cst_111 {dimension_numbers = #tpu.dot_dimension_numbers<[1], [0], [0], [1], [0, 0, 1, 1], [], []>} : vector<8x16xbf16>, vector<16x512xbf16>, vector<8x512xf32> -> vector<8x512xf32>
    %78 = arith.addf %65, %77 : vector<8x512xf32>
    %c6 = arith.constant 6 : index
    %c0_112 = arith.constant 0 : index
    %c0_113 = arith.constant 0 : index
    %79 = vector.load %arg2[%c6, %c0_112, %c0_113] : memref<9x8x16xbf16, #tpu.memory_space<vmem>>, vector<1x8x16xbf16>
    %80 = vector.shape_cast %79 : vector<1x8x16xbf16> to vector<8x16xbf16>
    %c0_114 = arith.constant 0 : index
    %c0_115 = arith.constant 0 : index
    %c0_116 = arith.constant 0 : index
    %c8_117 = arith.constant 8 : index
    %81 = vector.load %arg1[%c0_114, %c0_115, %c0_116, %c8_117] : memref<1x4x16x256xbf16, #tpu.memory_space<vmem>>, vector<1x1x16x128xbf16>
    %82 = vector.shape_cast %81 : vector<1x1x16x128xbf16> to vector<16x128xbf16>
    %c0_118 = arith.constant 0 : index
    %c1_119 = arith.constant 1 : index
    %c0_120 = arith.constant 0 : index
    %c8_121 = arith.constant 8 : index
    %83 = vector.load %arg1[%c0_118, %c1_119, %c0_120, %c8_121] : memref<1x4x16x256xbf16, #tpu.memory_space<vmem>>, vector<1x1x16x128xbf16>
    %84 = vector.shape_cast %83 : vector<1x1x16x128xbf16> to vector<16x128xbf16>
    %c0_122 = arith.constant 0 : index
    %c2_123 = arith.constant 2 : index
    %c0_124 = arith.constant 0 : index
    %c8_125 = arith.constant 8 : index
    %85 = vector.load %arg1[%c0_122, %c2_123, %c0_124, %c8_125] : memref<1x4x16x256xbf16, #tpu.memory_space<vmem>>, vector<1x1x16x128xbf16>
    %86 = vector.shape_cast %85 : vector<1x1x16x128xbf16> to vector<16x128xbf16>
    %c0_126 = arith.constant 0 : index
    %c3_127 = arith.constant 3 : index
    %c0_128 = arith.constant 0 : index
    %c8_129 = arith.constant 8 : index
    %87 = vector.load %arg1[%c0_126, %c3_127, %c0_128, %c8_129] : memref<1x4x16x256xbf16, #tpu.memory_space<vmem>>, vector<1x1x16x128xbf16>
    %88 = vector.shape_cast %87 : vector<1x1x16x128xbf16> to vector<16x128xbf16>
    %89 = tpu.concatenate %82, %84, %86, %88 in 1 : vector<16x128xbf16>, vector<16x128xbf16>, vector<16x128xbf16>, vector<16x128xbf16> -> vector<16x512xbf16>
    %cst_130 = arith.constant dense<0.000000e+00> : vector<8x512xf32>
    %90 = tpu.matmul %80, %89, %cst_130 {dimension_numbers = #tpu.dot_dimension_numbers<[1], [0], [0], [1], [0, 0, 1, 1], [], []>} : vector<8x16xbf16>, vector<16x512xbf16>, vector<8x512xf32> -> vector<8x512xf32>
    %91 = arith.addf %78, %90 : vector<8x512xf32>
    %c7 = arith.constant 7 : index
    %c0_131 = arith.constant 0 : index
    %c0_132 = arith.constant 0 : index
    %92 = vector.load %arg2[%c7, %c0_131, %c0_132] : memref<9x8x16xbf16, #tpu.memory_space<vmem>>, vector<1x8x16xbf16>
    %93 = vector.shape_cast %92 : vector<1x8x16xbf16> to vector<8x16xbf16>
    %c0_133 = arith.constant 0 : index
    %c1_134 = arith.constant 1 : index
    %c0_135 = arith.constant 0 : index
    %c8_136 = arith.constant 8 : index
    %94 = vector.load %arg1[%c0_133, %c1_134, %c0_135, %c8_136] : memref<1x4x16x256xbf16, #tpu.memory_space<vmem>>, vector<1x1x16x128xbf16>
    %95 = vector.shape_cast %94 : vector<1x1x16x128xbf16> to vector<16x128xbf16>
    %c0_137 = arith.constant 0 : index
    %c0_138 = arith.constant 0 : index
    %c0_139 = arith.constant 0 : index
    %c9_140 = arith.constant 9 : index
    %96 = vector.load %arg1[%c0_137, %c0_138, %c0_139, %c9_140] : memref<1x4x16x256xbf16, #tpu.memory_space<vmem>>, vector<1x1x16x128xbf16>
    %97 = vector.shape_cast %96 : vector<1x1x16x128xbf16> to vector<16x128xbf16>
    %c0_141 = arith.constant 0 : index
    %c3_142 = arith.constant 3 : index
    %c0_143 = arith.constant 0 : index
    %c8_144 = arith.constant 8 : index
    %98 = vector.load %arg1[%c0_141, %c3_142, %c0_143, %c8_144] : memref<1x4x16x256xbf16, #tpu.memory_space<vmem>>, vector<1x1x16x128xbf16>
    %99 = vector.shape_cast %98 : vector<1x1x16x128xbf16> to vector<16x128xbf16>
    %c0_145 = arith.constant 0 : index
    %c2_146 = arith.constant 2 : index
    %c0_147 = arith.constant 0 : index
    %c9_148 = arith.constant 9 : index
    %100 = vector.load %arg1[%c0_145, %c2_146, %c0_147, %c9_148] : memref<1x4x16x256xbf16, #tpu.memory_space<vmem>>, vector<1x1x16x128xbf16>
    %101 = vector.shape_cast %100 : vector<1x1x16x128xbf16> to vector<16x128xbf16>
    %102 = tpu.concatenate %95, %97, %99, %101 in 1 : vector<16x128xbf16>, vector<16x128xbf16>, vector<16x128xbf16>, vector<16x128xbf16> -> vector<16x512xbf16>
    %cst_149 = arith.constant dense<0.000000e+00> : vector<8x512xf32>
    %103 = tpu.matmul %93, %102, %cst_149 {dimension_numbers = #tpu.dot_dimension_numbers<[1], [0], [0], [1], [0, 0, 1, 1], [], []>} : vector<8x16xbf16>, vector<16x512xbf16>, vector<8x512xf32> -> vector<8x512xf32>
    %104 = arith.addf %91, %103 : vector<8x512xf32>
    %c8_150 = arith.constant 8 : index
    %c0_151 = arith.constant 0 : index
    %c0_152 = arith.constant 0 : index
    %105 = vector.load %arg2[%c8_150, %c0_151, %c0_152] : memref<9x8x16xbf16, #tpu.memory_space<vmem>>, vector<1x8x16xbf16>
    %106 = vector.shape_cast %105 : vector<1x8x16xbf16> to vector<8x16xbf16>
    %c0_153 = arith.constant 0 : index
    %c0_154 = arith.constant 0 : index
    %c0_155 = arith.constant 0 : index
    %c9_156 = arith.constant 9 : index
    %107 = vector.load %arg1[%c0_153, %c0_154, %c0_155, %c9_156] : memref<1x4x16x256xbf16, #tpu.memory_space<vmem>>, vector<1x1x16x128xbf16>
    %108 = vector.shape_cast %107 : vector<1x1x16x128xbf16> to vector<16x128xbf16>
    %c0_157 = arith.constant 0 : index
    %c1_158 = arith.constant 1 : index
    %c0_159 = arith.constant 0 : index
    %c9_160 = arith.constant 9 : index
    %109 = vector.load %arg1[%c0_157, %c1_158, %c0_159, %c9_160] : memref<1x4x16x256xbf16, #tpu.memory_space<vmem>>, vector<1x1x16x128xbf16>
    %110 = vector.shape_cast %109 : vector<1x1x16x128xbf16> to vector<16x128xbf16>
    %c0_161 = arith.constant 0 : index
    %c2_162 = arith.constant 2 : index
    %c0_163 = arith.constant 0 : index
    %c9_164 = arith.constant 9 : index
    %111 = vector.load %arg1[%c0_161, %c2_162, %c0_163, %c9_164] : memref<1x4x16x256xbf16, #tpu.memory_space<vmem>>, vector<1x1x16x128xbf16>
    %112 = vector.shape_cast %111 : vector<1x1x16x128xbf16> to vector<16x128xbf16>
    %c0_165 = arith.constant 0 : index
    %c3_166 = arith.constant 3 : index
    %c0_167 = arith.constant 0 : index
    %c9_168 = arith.constant 9 : index
    %113 = vector.load %arg1[%c0_165, %c3_166, %c0_167, %c9_168] : memref<1x4x16x256xbf16, #tpu.memory_space<vmem>>, vector<1x1x16x128xbf16>
    %114 = vector.shape_cast %113 : vector<1x1x16x128xbf16> to vector<16x128xbf16>
    %115 = tpu.concatenate %108, %110, %112, %114 in 1 : vector<16x128xbf16>, vector<16x128xbf16>, vector<16x128xbf16>, vector<16x128xbf16> -> vector<16x512xbf16>
    %cst_169 = arith.constant dense<0.000000e+00> : vector<8x512xf32>
    %116 = tpu.matmul %106, %115, %cst_169 {dimension_numbers = #tpu.dot_dimension_numbers<[1], [0], [0], [1], [0, 0, 1, 1], [], []>} : vector<8x16xbf16>, vector<16x512xbf16>, vector<8x512xf32> -> vector<8x512xf32>
    %117 = arith.addf %104, %116 : vector<8x512xf32>
    %118 = vector.extract_strided_slice %117 {offsets = [0, 0], sizes = [8, 128], strides = [1, 1]} : vector<8x512xf32> to vector<8x128xf32>
    %119 = vector.extract_strided_slice %117 {offsets = [0, 128], sizes = [8, 128], strides = [1, 1]} : vector<8x512xf32> to vector<8x128xf32>
    %120 = arith.maximumf %118, %119 : vector<8x128xf32>
    %121 = vector.extract_strided_slice %117 {offsets = [0, 256], sizes = [8, 128], strides = [1, 1]} : vector<8x512xf32> to vector<8x128xf32>
    %122 = vector.extract_strided_slice %117 {offsets = [0, 384], sizes = [8, 128], strides = [1, 1]} : vector<8x512xf32> to vector<8x128xf32>
    %123 = arith.maximumf %121, %122 : vector<8x128xf32>
    %124 = arith.maximumf %120, %123 : vector<8x128xf32>
    %c0_170 = arith.constant 0 : index
    %c0_171 = arith.constant 0 : index
    %125 = vector.load %arg3[%c0_170, %c0_171] : memref<8x1xf32, #tpu.memory_space<vmem>>, vector<8x1xf32>
    %126 = vector.broadcast %125 : vector<8x1xf32> to vector<8x128xf32>
    %127 = arith.addf %124, %126 : vector<8x128xf32>
    %cst_172 = arith.constant 0.000000e+00 : f32
    %128 = vector.broadcast %cst_172 : f32 to vector<8x128xf32>
    %129 = arith.maximumf %127, %128 : vector<8x128xf32>
    %c0_173 = arith.constant 0 : index
    %c0_174 = arith.constant 0 : index
    %c0_175 = arith.constant 0 : index
    %130 = vector.load %arg4[%c0_173, %c0_174, %c0_175] : memref<1x8x128xf32, #tpu.memory_space<vmem>>, vector<1x8x128xf32>
    %131 = vector.shape_cast %130 : vector<1x8x128xf32> to vector<8x128xf32>
    %132 = vector.shape_cast %129 : vector<8x128xf32> to vector<1x8x128xf32>
    tpu.vector_store %arg4[%c0_173, %c0_174, %c0_175], %132 {strides = array<i32>} : memref<1x8x128xf32, #tpu.memory_space<vmem>>, vector<1x8x128xf32>,
    return
  }
  func.func @transform_0(%arg0: i32) -> (i32, i32, i32, i32) {
    %c0_i32 = arith.constant 0 : i32
    %c0_i32_0 = arith.constant 0 : i32
    %c0_i32_1 = arith.constant 0 : i32
    %c0_i32_2 = arith.constant 0 : i32
    return %arg0, %c0_i32, %c0_i32_0, %c0_i32_1 : i32, i32, i32, i32
  }
  func.func @transform_1(%arg0: i32) -> (i32, i32, i32) {
    %c0_i32 = arith.constant 0 : i32
    %c0_i32_0 = arith.constant 0 : i32
    %c0_i32_1 = arith.constant 0 : i32
    %c0_i32_2 = arith.constant 0 : i32
    return %c0_i32, %c0_i32_0, %c0_i32_1 : i32, i32, i32
  }
  func.func @transform_2(%arg0: i32) -> (i32, i32) {
    %c0_i32 = arith.constant 0 : i32
    %c0_i32_0 = arith.constant 0 : i32
    %c0_i32_1 = arith.constant 0 : i32
    return %c0_i32, %c0_i32_0 : i32, i32
  }
  func.func @transform_3(%arg0: i32) -> (i32, i32, i32) {
    %c0_i32 = arith.constant 0 : i32
    %c0_i32_0 = arith.constant 0 : i32
    %c0_i32_1 = arith.constant 0 : i32
    return %arg0, %c0_i32, %c0_i32_0 : i32, i32, i32
  }
}

</mosaic_0001>

<bundles_post_ra>
// kernel: tpu_custom_call.1
= control target key start
LH: loop header
LB: loop body
LE: loop exit
PB: predicated region body
PF: predicated region fallthrough
CT: control target
= control target key end

     0   :  { %8 = vsyncpa [#allocation3], 0  ;;  %s1815_s0 = inlined_call_operand.hbm [shape: bf16[2,4,16,256], index: 0, kind: input, shape index: {}]   ;;  %s1816_s1 = inlined_call_operand.hbm [shape: bf16[9,8,16], index: 1, kind: input, shape index: {}]   ;;  %s1817_s2 = inlined_call_operand.vmem [shape: f32[8,1], index: 2, kind: input, shape index: {}]   ;;  %s1818_s3 = inlined_call_operand.hbm [shape: f32[2,8,128], index: 3, kind: output, shape index: {}]  }
   0x1   :  { %10 = vsyncpa [#allocation3 + $0x1], 0 }
   0x2   :  { %11 = vsyncpa [#allocation6], 0 }
   0x3   :  { %12 = vsyncpa [#allocation4], 0 }
   0x4   :  { %14 = vsyncpa [#allocation4 + $0x1], 0  ;;  %s1567_s12 = smov 0   ;;  %s1569_s13 = smov 0  }
   0x5   :  { %s1571_s14 = smov 0   ;;  %s1573_s15 = smov 0  }
   0x6 LB: > { %s1588_s16 = sadd.s32 4294967295, %s1534_s15   ;;  %s1272_s17 = sadd.s32 4294967294, %s1534_s15   ;;  %s1534_s15 = sphi %s1573_s15, %s1840_s15   ;;  %s1530_s14 = sphi %s1571_s14, %s1839_s14   ;;  %s1526_s13 = sphi %s1569_s13, %s1838_s13   ;;  %s1522_s12 = sphi %s1567_s12, %s1837_s12  }
   0x7   : > { %p40_p0 = scmp.ne.s32.totalorder %s1526_s13, %s1522_s12  ;;  %p1819_p1 = scmp.eq.s32.totalorder %s1588_s16, 0 }
   0x8   : > { %p112_p3 = scmp.eq.s32.totalorder %s1272_s17, 1  ;;  %p1273_p5 = scmp.ge.s32.totalorder %s1534_s15, 1 }
   0x9   : > { %p1597_p4 = por %p1819_p1, %p40_p0  ;;  %p119_p7 = scmp.lt.s32.totalorder %s1534_s15, 3 }
   0xa   : > { %p1602_p6 = por %p112_p3, %p40_p0  ;;  %s1536_s21 = smov [#allocation5]  }
   0xb   : > { %s1823_s18 = scalar_select %p1597_p4, 1, 0 }
   0xc   : > { %s1824_s19 = scalar_select %p1602_p6, 1, 0 }
   0xd   : > { %p1607_p8 = pnand %p1273_p5, %p119_p7  ;;  %s131_s22 = sshll.u32 %s1536_s21, 4  ;;  %s132_s22 = int_to_ptr.vmem [resolvable:$true] %s131_s22 }
   0xe   : > { %s1621_s24 = sadd.s32 1, %s1534_s15   ;;  %s27_s25 = sadd.s32 1, %s1530_s14 }
   0xf   : > { %s1825_s20 = scalar_select %p1607_p8, 1, 0 }
  0x10   : > { %p1338_p9 = pneg %p1607_p8  ;;  %s24_s26 = ssub.s32 %s1534_s15, %s1621_s24 }
  0x11   : > { %s1423_s27 = scalar_lea.vmem %s132_s22, 576  ;;  %p1431_p5 = scmp.lt.s32.totalorder %s132_s22, %s132_s22 }
  0x12   : > { %p1616_p11 = pnand %p1338_p9, %p1819_p1  ;;  %p1424_p13 = scmp.ne.s32.totalorder %s132_s22, %s1423_s27 }
  0x13   : > { %p1432_p7 = scmp.lt.s32.totalorder %s1423_s27, %s1423_s27 }
  0x14   : > { %p1414_p12 = pneg %p1616_p11 }
  0x15   : > { %p1433_p10 = por %p1432_p7, %p1431_p5 }
  0x16   : > { %p1426_p0 = pnand %p1424_p13, %p1414_p12 }
  0x18   : > { %p1427_p3 = pneg %p1426_p0 }
  0x1a   : > { %p1434_p2 = pnand %p1433_p10, %p1427_p3 }
  0x1c   : > { %1437 = shalt.err (!%p1434_p2)
}
  0x1d   : > { %s1537_s28 = smov 64   ;;  %s1538_s29 = smov 4  }
  0x1e   : > { %1341 = dma.hbm_to_vmem [thread:$0]  (!%p1616_p11), %s1816_s1, 576, %s132_s22, [#allocation6], %s1537_s28, %s1537_s28, %s1538_s29  }
  0x1f   : > { %p25_p9 = scmp.eq.s32.totalorder %s24_s26, 0  ;;  %p34_p12 = scmp.ne.s32.totalorder %s1530_s14, %s1526_s13 }
  0x20   : > { %p35_p10 = scmp.eq.s32.totalorder %s1534_s15, 0  ;;  %p1351_p2 = scmp.lt.s32.totalorder %s1534_s15, 2 }
  0x21   : > { %s1638_s5 = scalar_select %p25_p9, %s1530_s14, %s27_s25  }
  0x22   : > { %p36_p13 = por %p35_p10, %p34_p12  ;;  %p1827_p0 = scmp.eq.s32.totalorder %s1588_s16, 1 }
  0x23   : > { %s148_s7 = sand.u32 1, %s1530_s14   ;;  %s1329_s8 = sshll.u32 %s1534_s15, 10 }
  0x24   : > { %p1642_p3 = por %p1827_p0, %p34_p12  ;;  %s1276_s9 = sshll.u32 %s148_s7, 6 }
  0x25   : > { %s1651_s17 = scalar_lea.hbm %s1815_s0, %s1329_s8  ;;  %s152_s21 = scalar_lea.vmem [#allocation2], %s1276_s9 }
  0x26   : > { %s1828_s6 = scalar_select %p1642_p3, 1, 0 }
  0x27   : > { %s159_s22 = sshll.u32 %s152_s21, 4  ;;  %p1653_p11 = pnand %p1351_p2, %p36_p13  ;;  %s1657_s22 = int_to_ptr.vmem [resolvable:$true] %s159_s22 }
  0x28   : > { %s1659_s25 = scalar_lea.sflag [#allocation3], %s148_s7  ;;  %s1438_s26 = scalar_lea.hbm %s1651_s17, 1024 }
  0x29   : > { %p1439_p5 = scmp.ne.s32.totalorder %s1651_s17, %s1438_s26  ;;  %p1440_p7 = pneg %p1653_p11 }
  0x2a   : > { %s1443_s29 = scalar_lea.hbm %s1815_s0, 2048  ;;  %p1444_p10 = scmp.lt.s32.totalorder %s1651_s17, %s1815_s0 }
  0x2b   : > { %p1441_p9 = pnand %p1440_p7, %p1439_p5  ;;  %p1445_p2 = scmp.lt.s32.totalorder %s1443_s29, %s1438_s26 }
  0x2d   : > { %p1442_p12 = pneg %p1441_p9  ;;  %p1446_p13 = por %p1445_p2, %p1444_p10 }
  0x2f   : > { %p1447_p0 = pnand %p1446_p13, %p1442_p12 }
  0x31   : > { %1450 = shalt.err (!%p1447_p0)
}
  0x32   : > { %s1451_s7 = scalar_lea.vmem %s1657_s22, 1024  ;;  %s1539_s8 = smov [#allocation2]  }
  0x33   : > { %p1452_p1 = scmp.ne.s32.totalorder %s1657_s22, %s1451_s7  ;;  %s1456_s9 = sshll.u32 %s1539_s8, 4  ;;  %s1457_s9 = int_to_ptr.vmem [resolvable:$false] %s1456_s9 }
  0x34   : > { %s1458_s10 = scalar_lea.vmem %s1457_s9, 2048  ;;  %p1459_p9 = scmp.lt.s32.totalorder %s1657_s22, %s1457_s9 }
  0x35   : > { %p1454_p6 = pnand %p1452_p1, %p1440_p7  ;;  %p1460_p3 = scmp.lt.s32.totalorder %s1458_s10, %s1451_s7 }
  0x37   : > { %p1455_p5 = pneg %p1454_p6  ;;  %p1461_p4 = por %p1460_p3, %p1459_p9 }
  0x39   : > { %p1462_p8 = pnand %p1461_p4, %p1455_p5 }
  0x3b   : > { %1465 = shalt.err (!%p1462_p8)
}
  0x3c   : > { %s1540_s11 = smov 128   ;;  %s1541_s21 = smov 8  }
  0x3d   : > { %1345 = dma.hbm_to_vmem [thread:$0]  (!%p1653_p11), %s1651_s17, 1024, %s1657_s22, %s1659_s25, %s1540_s11, %s1540_s11, %s1541_s21  }
  0x3e   : > { %p1830_p1 = scmp.ne.s32.totalorder %s1825_s20, 0 }
  0x3f   : > { %s1683_s26 = sand.u32 (!%p1830_p1), 1, %s1526_s13   ;;  %p1831_p4 = scmp.ne.s32.totalorder (!%p1830_p1), %s1823_s18, 0 }
  0x40   : > { %171 = sbr.rel (%p1830_p1) target bundleno = 482 (0x1e2), region = 32  ;;  %s1280_s27 = sshll.u32 (!%p1830_p1), %s1683_s26, 6 }
  0x41   : > { %s174_s28 = scalar_lea.sflag (!%p1830_p1), [#allocation3], %s1683_s26  ;;  %s1687_s29 = scalar_lea.vmem (!%p1830_p1), [#allocation2], %s1280_s27 }
  0x45   : > { %1509 = dma.done.wait (%p1831_p4), %s174_s28, 1024  }
  0x46   : > { %1511 = vsyncadd (%p1831_p4), %s174_s28, 4294966272  ;;  %p1832_p6 = scmp.eq.s32.totalorder %s1588_s16, 0 }
  0x48   : > { %1513 = dma.done.wait (%p1832_p6), [#allocation6], 576   ;;  %p1833_p8 = pmov %p1832_p6 }
  0x49   : > { %v1542_v0 = vmov 0   ;;  %v1396_v1 = vld [vmem:[%s1687_s29 + $0x20] ss:$8 sps:$4 sm:$0xff]   ;;  %s1543_s18 = smov 127   ;;  %v1400_v3 = vld [vmem:[%s1687_s29 + $0x24] ss:$8 sps:$4 sm:$0xff]  }
  0x4a   : > { %1515 = vsyncadd (%p1833_p8), [#allocation6], 4294966720  ;;  %312 = vmatprep.mubr.bf16.mxu0 %v1542_v0  ;;  %353 = vmatprep.mubr.bf16.mxu1 %v1542_v0  ;;  %v1398_v2 = vld [vmem:[%s1687_s29] ss:$8 sps:$4 sm:$0xff]   ;;  %v1401_v4 = vld [vmem:[%s1687_s29 + $0x4] ss:$8 sps:$4 sm:$0xff]  }
  0x4b   : > { %1395 = vset.pattern.permute.xlu0 %v1542_v0  ;;  %270 = vrot.lane.b32.xlu1 %v1396_v1, %s1543_s18  ;;  %v1402_v5 = vld [vmem:[%s1687_s29 + $0x14] ss:$8 sps:$4 sm:$0xff]   ;;  %v1404_v6 = vld [vmem:[%s1687_s29 + $0x10] ss:$8 sps:$4 sm:$0xff]   ;;  %s1544_s20 = smov 120   ;;  %s1545_s17 = smov 119  }
  0x4c   : > { %255 = vrot.lane.b32.xlu0 %v1398_v2, %s1543_s18  ;;  %v1405_v7 = vld [vmem:[%s1687_s29 + $0x34] ss:$8 sps:$4 sm:$0xff]   ;;  %v1407_v8 = vld [vmem:[%s1687_s29 + $0x30] ss:$8 sps:$4 sm:$0xff]   ;;  %v1169_v9 = vld [vmem:[%s1817_s2] sm:$0xff]  ;;  %vm259_vm0 = vcmask 1039360  }
  0x4d   : > { %v1712_v12 = vld [vmem:[%s1687_s29 + $0x30] ss:$8 sps:$4 sm:$0xff]   ;;  %v242_v18 = vld [vmem:[#allocation5 + $0x4] sm:$0xf]  ;;  %vm276_vm1 = vcmask 130048   ;;  %vm576_vm2 = vcmask 982016  }
  0x4e   : > { %v1408_v14 = vld [vmem:[%s1687_s29 + $0x10] ss:$8 sps:$4 sm:$0xff]   ;;  %v1411_v19 = vld [vmem:[%s1687_s29 + $0x20] ss:$8 sps:$4 sm:$0xff]   ;;  %vm680_vm3 = vcmask 973824   ;;  %s1282_s25 = sshll.u32 %s1683_s26, 3 }
  0x4f   : > { %272 = vrot.lane.b32.xlu1 %v1400_v3, %s1543_s18  ;;  %v1410_v21 = vld [vmem:[%s1687_s29] ss:$8 sps:$4 sm:$0xff]   ;;  %v571_v38 = vld [vmem:[#allocation5 + $0xc] sm:$0xf]  ;;  %v675_v44 = vld [vmem:[#allocation5 + $0x10] sm:$0xf] }
  0x50   : > { %257 = vrot.lane.b32.xlu0 %v1401_v4, %s1543_s18  ;;  %v205_v27 = vld [vmem:[#allocation5] sm:$0xf]  ;;  %v448_v33 = vld [vmem:[#allocation5 + $0x8] sm:$0xf]  ;;  %v773_v48 = vld [vmem:[#allocation5 + $0x14] sm:$0xf] }
  0x51   : > { %v870_v53 = vld [vmem:[#allocation5 + $0x18] sm:$0xf]  ;;  %v973_v57 = vld [vmem:[#allocation5 + $0x1c] sm:$0xf]  ;;  %v1070_v58 = vld [vmem:[#allocation5 + $0x20] sm:$0xf] }
  0x52   : > { %s1326_s30 = sshll.u32 %s1588_s16, 7  ;;  %s203_s4 = scalar_lea.vmem [#allocation7], %s1282_s25 }
  0x53   : > { %463 = vrot.lane.b32.xlu1 %v1402_v5, %s1543_s18  ;;  %s1192_s7 = sshll.u32 %s203_s4, 4  ;;  %s1190_s10 = scalar_lea.hbm %s1818_s3, %s1326_s30  ;;  %s1193_s7 = int_to_ptr.vmem [resolvable:$true] %s1192_s7 }
  0x54   : > { %461 = vrot.lane.b32.xlu0 %v1404_v6, %s1543_s18  ;;  %s1179_s11 = scalar_lea.sflag [#allocation4], %s1683_s26  ;;  %s1466_s21 = scalar_lea.vmem %s1193_s7, 128 }
  0x55   : > { %p1467_p3 = scmp.ne.s32.totalorder %s1193_s7, %s1466_s21  ;;  %p1834_p11 = scmp.ne.s32.totalorder %s1828_s6, 0 }
  0x56   : > { %s1546_s27 = smov [#allocation7]  }
  0x57   : > { %477 = vrot.lane.b32.xlu1 %v1405_v7, %s1543_s18  ;;  %p1468_p7 = pnand %p1467_p3, %p1834_p11  ;;  %s1470_s28 = sshll.u32 %s1546_s27, 4  ;;  %s1471_s28 = int_to_ptr.vmem [resolvable:$false] %s1470_s28 }
  0x58   : > { %475 = vrot.lane.b32.xlu0 %v1407_v8, %s1543_s18  ;;  %s1472_s16 = scalar_lea.vmem %s1471_s28, 256  ;;  %p1473_p10 = scmp.lt.s32.totalorder %s1193_s7, %s1471_s28 }
  0x59   : > { %p1469_p12 = pneg %p1468_p7  ;;  %p1474_p2 = scmp.lt.s32.totalorder %s1472_s16, %s1466_s21 }
  0x5b   : > { %581 = vrot.lane.b32.xlu1 %v1402_v5, %s1544_s20  ;;  %p1475_p13 = por %p1474_p2, %p1473_p10 }
  0x5c   : > { %579 = vrot.lane.b32.xlu0 %v1404_v6, %s1544_s20 }
  0x5d   : > { %p1476_p0 = pnand %p1475_p13, %p1469_p12 }
  0x5f   : > { %574 = vrot.lane.b32.xlu1 %v1401_v4, %s1544_s20 }
  0x60   : > { %572 = vrot.lane.b32.xlu0 %v1398_v2, %s1544_s20 }
  0x63   : > { %678 = vrot.lane.b32.xlu1 %v1401_v4, %s1545_s17 }
  0x64   : > { %676 = vrot.lane.b32.xlu0 %v1398_v2, %s1545_s17 }
  0x67   : > { %776 = vrot.lane.b32.xlu1 %v1402_v5, %s1545_s17 }
  0x68   : > { %774 = vrot.lane.b32.xlu0 %v1404_v6, %s1545_s17 }
  0x6b   : > { %879 = vrot.lane.b32.xlu1 %v1405_v7, %s1544_s20 }
  0x6c   : > { %877 = vrot.lane.b32.xlu0 %v1407_v8, %s1544_s20 }
  0x6f   : > { %873 = vrot.lane.b32.xlu1 %v1400_v3, %s1544_s20 }
  0x70   : > { %871 = vrot.lane.b32.xlu0 %v1396_v1, %s1544_s20 }
  0x73   : > { %976 = vrot.lane.b32.xlu1 %v1400_v3, %s1545_s17 }
  0x74   : > { %974 = vrot.lane.b32.xlu0 %v1396_v1, %s1545_s17 }
  0x77   : > { %1073 = vrot.lane.b32.xlu1 %v1405_v7, %s1545_s17 }
  0x78   : > { %1071 = vrot.lane.b32.xlu0 %v1407_v8, %s1545_s17 }
  0x7c   : > { %1172 = vperm.xlu0 %1395, %v1169_v9  }
  0xbd   : > { %v271_v10 = vpop.permute.xlu1 %270 }
  0xbe   : > { %v256_v11 = vpop.permute.xlu0 %255 }
  0xc1   : > { %v273_v13 = vpop.permute.xlu1 %272 }
  0xc2   : > { %v1716_v15 = vsel %vm259_vm0, %v271_v10, %v273_v13  ;;  %v258_v16 = vpop.permute.xlu0 %257 }
  0xc3   : > { %v260_v17 = vsel %vm259_vm0, %v256_v11, %v258_v16  ;;  %335 = vmatprep.subr.bf16.mxu1 %v1716_v15 }
  0xc4   : > { %294 = vmatprep.subr.bf16.mxu0 %v260_v17  ;;  %336 = vmatpush1.bf16.msra.mxu1 %v1712_v12 }
  0xc5   : > { %295 = vmatpush1.bf16.msra.mxu0 %v1408_v14  ;;  %420 = vmatprep.subr.bf16.mxu1 %v1712_v12  ;;  %v464_v20 = vpop.permute.xlu1 %463 }
  0xc6   : > { %379 = vmatprep.subr.bf16.mxu0 %v1408_v14  ;;  %v462_v22 = vpop.permute.xlu0 %461 }
  0xc7   : > { %1300 = vmatmul.mubr.msk.bf16.vlgmr.msra.gmra.mxu1 %vm276_vm1, %v242_v18  ;;  %v465_v23 = vsel %vm259_vm0, %v462_v22, %v464_v20 }
  0xc8   : > { %1299 = vmatmul.mubr.msk.bf16.vlgmr.msra.gmra.mxu0 %vm276_vm1, %v242_v18  ;;  %421 = vmatpush1.bf16.msra.mxu1 %v1411_v19 }
  0xc9   : > { %380 = vmatpush1.bf16.msra.mxu0 %v1410_v21  ;;  %v478_v24 = vpop.permute.xlu1 %477  ;;  %397 = vmatprep.mubr.bf16.mxu0 %v1542_v0 }
  0xca   : > { %498 = vmatprep.subr.bf16.mxu0 %v465_v23  ;;  %v476_v25 = vpop.permute.xlu0 %475  ;;  %438 = vmatprep.mubr.bf16.mxu1 %v1542_v0 }
  0xcb   : > { %v479_v26 = vsel %vm259_vm0, %v476_v25, %v478_v24 }
  0xcc   : > { %539 = vmatprep.subr.bf16.mxu1 %v479_v26 }
  0xcd   : > { %v582_v28 = vpop.permute.xlu1 %581 }
  0xce   : > { %v580_v29 = vpop.permute.xlu0 %579 }
  0xcf   : > { %1302 = vmatmul.mubr.msk.bf16.vlgmr.msra.gmra.mxu1 %vm276_vm1, %v205_v27  ;;  %v1732_v30 = vsel %vm576_vm2, %v580_v29, %v582_v28 }
  0xd0   : > { %1301 = vmatmul.mubr.msk.bf16.vlgmr.msra.gmra.mxu0 %vm276_vm1, %v205_v27  ;;  %540 = vmatpush1.bf16.msra.mxu1 %v1716_v15 }
  0xd1   : > { %499 = vmatpush1.bf16.msra.mxu0 %v260_v17  ;;  %643 = vmatprep.subr.bf16.mxu1 %v1732_v30  ;;  %v575_v31 = vpop.permute.xlu1 %574 }
  0xd2   : > { %v573_v32 = vpop.permute.xlu0 %572  ;;  %516 = vmatprep.mubr.bf16.mxu0 %v1542_v0  ;;  %557 = vmatprep.mubr.bf16.mxu1 %v1542_v0 }
  0xd3   : > { %602 = vmatprep.subr.bf16.mxu0 %v1712_v12  ;;  %v577_v34 = vsel %vm576_vm2, %v573_v32, %v575_v31 }
  0xd5   : > { %v679_v35 = vpop.permute.xlu1 %678 }
  0xd6   : > { %v677_v36 = vpop.permute.xlu0 %676 }
  0xd7   : > { %1312 = vmatmul.mubr.msk.bf16.vlgmr.msra.gmra.mxu1 %vm276_vm1, %v448_v33  ;;  %v681_v37 = vsel %vm680_vm3, %v677_v36, %v679_v35 }
  0xd8   : > { %1311 = vmatmul.mubr.msk.bf16.vlgmr.msra.gmra.mxu0 %vm276_vm1, %v448_v33  ;;  %644 = vmatpush1.bf16.msra.mxu1 %v577_v34 }
  0xd9   : > { %603 = vmatpush1.bf16.msra.mxu0 %v1411_v19  ;;  %620 = vmatprep.mubr.bf16.mxu0 %v1542_v0  ;;  %v777_v39 = vpop.permute.xlu1 %776 }
  0xda   : > { %700 = vmatprep.subr.bf16.mxu0 %v1716_v15  ;;  %661 = vmatprep.mubr.bf16.mxu1 %v1542_v0  ;;  %v775_v40 = vpop.permute.xlu0 %774 }
  0xdb   : > { %741 = vmatprep.subr.bf16.mxu1 %v681_v37  ;;  %v778_v41 = vsel %vm680_vm3, %v775_v40, %v777_v39 }
  0xdd   : > { %v880_v42 = vpop.permute.xlu1 %879 }
  0xde   : > { %v878_v43 = vpop.permute.xlu0 %877 }
  0xdf   : > { %1314 = vmatmul.mubr.msk.bf16.vlgmr.msra.gmra.mxu1 %vm276_vm1, %v571_v38  ;;  %v881_v45 = vsel %vm576_vm2, %v878_v43, %v880_v42 }
  0xe0   : > { %1313 = vmatmul.mubr.msk.bf16.vlgmr.msra.gmra.mxu0 %vm276_vm1, %v571_v38  ;;  %742 = vmatpush1.bf16.msra.mxu1 %v1732_v30 }
  0xe1   : > { %701 = vmatpush1.bf16.msra.mxu0 %v1712_v12  ;;  %718 = vmatprep.mubr.bf16.mxu0 %v1542_v0  ;;  %v874_v46 = vpop.permute.xlu1 %873 }
  0xe2   : > { %797 = vmatprep.subr.bf16.mxu0 %v479_v26  ;;  %759 = vmatprep.mubr.bf16.mxu1 %v1542_v0  ;;  %v872_v47 = vpop.permute.xlu0 %871 }
  0xe3   : > { %838 = vmatprep.subr.bf16.mxu1 %v778_v41  ;;  %v875_v49 = vsel %vm576_vm2, %v872_v47, %v874_v46 }
  0xe5   : > { %v977_v50 = vpop.permute.xlu1 %976 }
  0xe6   : > { %v975_v51 = vpop.permute.xlu0 %974 }
  0xe7   : > { %1316 = vmatmul.mubr.msk.bf16.vlgmr.msra.gmra.mxu1 %vm276_vm1, %v675_v44  ;;  %v978_v52 = vsel %vm680_vm3, %v975_v51, %v977_v50 }
  0xe8   : > { %1315 = vmatmul.mubr.msk.bf16.vlgmr.msra.gmra.mxu0 %vm276_vm1, %v675_v44  ;;  %839 = vmatpush1.bf16.msra.mxu1 %v681_v37 }
  0xe9   : > { %798 = vmatpush1.bf16.msra.mxu0 %v1716_v15  ;;  %941 = vmatprep.subr.bf16.mxu1 %v881_v45  ;;  %v1074_v54 = vpop.permute.xlu1 %1073 }
  0xea   : > { %900 = vmatprep.subr.bf16.mxu0 %v1732_v30  ;;  %815 = vmatprep.mubr.bf16.mxu0 %v1542_v0  ;;  %v1072_v55 = vpop.permute.xlu0 %1071 }
  0xeb   : > { %856 = vmatprep.mubr.bf16.mxu1 %v1542_v0  ;;  %v1075_v56 = vsel %vm680_vm3, %v1072_v55, %v1074_v54 }
  0xef   : > { %1318 = vmatmul.mubr.msk.bf16.vlgmr.msra.gmra.mxu1 %vm276_vm1, %v773_v48 }
  0xf0   : > { %1317 = vmatmul.mubr.msk.bf16.vlgmr.msra.gmra.mxu0 %vm276_vm1, %v773_v48  ;;  %942 = vmatpush1.bf16.msra.mxu1 %v875_v49 }
  0xf1   : > { %901 = vmatpush1.bf16.msra.mxu0 %v577_v34  ;;  %918 = vmatprep.mubr.bf16.mxu0 %v1542_v0 }
  0xf2   : > { %997 = vmatprep.subr.bf16.mxu0 %v681_v37  ;;  %959 = vmatprep.mubr.bf16.mxu1 %v1542_v0 }
  0xf3   : > { %1038 = vmatprep.subr.bf16.mxu1 %v978_v52 }
  0xf7   : > { %1320 = vmatmul.mubr.msk.bf16.vlgmr.msra.gmra.mxu1 %vm276_vm1, %v870_v53 }
  0xf8   : > { %1319 = vmatmul.mubr.msk.bf16.vlgmr.msra.gmra.mxu0 %vm276_vm1, %v870_v53  ;;  %1039 = vmatpush1.bf16.msra.mxu1 %v881_v45 }
  0xf9   : > { %998 = vmatpush1.bf16.msra.mxu0 %v1732_v30  ;;  %1015 = vmatprep.mubr.bf16.mxu0 %v1542_v0 }
  0xfa   : > { %1094 = vmatprep.subr.bf16.mxu0 %v778_v41  ;;  %1056 = vmatprep.mubr.bf16.mxu1 %v1542_v0 }
  0xfb   : > { %1135 = vmatprep.subr.bf16.mxu1 %v1075_v56 }
  0xff   : > { %1322 = vmatmul.mubr.msk.bf16.vlgmr.msra.gmra.mxu1 %vm276_vm1, %v973_v57 }
 0x100   : > { %1321 = vmatmul.mubr.msk.bf16.vlgmr.msra.gmra.mxu0 %vm276_vm1, %v973_v57  ;;  %1136 = vmatpush1.bf16.msra.mxu1 %v978_v52 }
 0x101   : > { %1095 = vmatpush1.bf16.msra.mxu0 %v681_v37  ;;  %1112 = vmatprep.mubr.bf16.mxu0 %v1542_v0 }
 0x102   : > { %1153 = vmatprep.mubr.bf16.mxu1 %v1542_v0 }
 0x107   : > { %1324 = vmatmul.mubr.msk.bf16.vlgmr.msra.gmra.mxu1 %vm276_vm1, %v1070_v58 }
 0x108   : > { %1323 = vmatmul.mubr.msk.bf16.vlgmr.msra.gmra.mxu0 %vm276_vm1, %v1070_v58 }
 0x187   : > { %v355_v59 = vpop.f32.mrf.mxu1 }
 0x188   : > { %v314_v60 = vpop.f32.mrf.mxu0 }
 0x189   : > { %v357_v61 = vpop.f32.mrf.mxu1 }
 0x18a   : > { %v316_v62 = vpop.f32.mrf.mxu0 }
 0x18b   : > { %v359_v63 = vpop.f32.mrf.mxu1 }
 0x18c   : > { %v318_v1 = vpop.f32.mrf.mxu0 }
 0x18d   : > { %v360_v2 = vpop.f32.mrf.mxu1 }
 0x18e   : > { %v319_v3 = vpop.f32.mrf.mxu0 }
 0x18f   : > { %v440_v4 = vpop.f32.mrf.mxu1 }
 0x190   : > { %v399_v5 = vpop.f32.mrf.mxu0  ;;  %v441_v48 = vadd.f32 %v440_v4, %v355_v59 }
 0x191   : > { %v442_v6 = vpop.f32.mrf.mxu1  ;;  %v400_v51 = vadd.f32 %v399_v5, %v314_v60 }
 0x192   : > { %v401_v7 = vpop.f32.mrf.mxu0  ;;  %v443_v49 = vadd.f32 %v442_v6, %v357_v61 }
 0x193   : > { %v444_v8 = vpop.f32.mrf.mxu1  ;;  %v402_v52 = vadd.f32 %v401_v7, %v316_v62 }
 0x194   : > { %v403_v9 = vpop.f32.mrf.mxu0 }
 0x195   : > { %v445_v0 = vpop.f32.mrf.mxu1 }
 0x196   : > { %v404_v10 = vpop.f32.mrf.mxu0 }
 0x197   : > { %v559_v11 = vpop.f32.mrf.mxu1 }
 0x198   : > { %v518_v12 = vpop.f32.mrf.mxu0  ;;  %v568_v54 = vadd.f32 %v559_v11, %v441_v48 }
 0x199   : > { %v561_v13 = vpop.f32.mrf.mxu1  ;;  %v566_v57 = vadd.f32 %v518_v12, %v400_v51 }
 0x19a   : > { %v520_v14 = vpop.f32.mrf.mxu0  ;;  %v569_v55 = vadd.f32 %v561_v13, %v443_v49 }
 0x19b   : > { %v563_v15 = vpop.f32.mrf.mxu1  ;;  %v567_v58 = vadd.f32 %v520_v14, %v402_v52 }
 0x19c   : > { %v522_v16 = vpop.f32.mrf.mxu0 }
 0x19d   : > { %v564_v17 = vpop.f32.mrf.mxu1 }
 0x19e   : > { %v523_v18 = vpop.f32.mrf.mxu0 }
 0x19f   : > { %v663_v19 = vpop.f32.mrf.mxu1 }
 0x1a0   : > { %v622_v20 = vpop.f32.mrf.mxu0  ;;  %v672_v1 = vadd.f32 %v663_v19, %v568_v54 }
 0x1a1   : > { %v665_v21 = vpop.f32.mrf.mxu1  ;;  %v670_v8 = vadd.f32 %v622_v20, %v566_v57 }
 0x1a2   : > { %v624_v22 = vpop.f32.mrf.mxu0  ;;  %v673_v2 = vadd.f32 %v665_v21, %v569_v55 }
 0x1a3   : > { %v667_v23 = vpop.f32.mrf.mxu1  ;;  %v671_v9 = vadd.f32 %v624_v22, %v567_v58 }
 0x1a4   : > { %v626_v24 = vpop.f32.mrf.mxu0 }
 0x1a5   : > { %v668_v25 = vpop.f32.mrf.mxu1 }
 0x1a6   : > { %v627_v26 = vpop.f32.mrf.mxu0 }
 0x1a7   : > { %v761_v27 = vpop.f32.mrf.mxu1 }
 0x1a8   : > { %v720_v28 = vpop.f32.mrf.mxu0  ;;  %v770_v10 = vadd.f32 %v761_v27, %v672_v1 }
 0x1a9   : > { %v763_v29 = vpop.f32.mrf.mxu1  ;;  %v768_v61 = vadd.f32 %v720_v28, %v670_v8 }
 0x1aa   : > { %v722_v30 = vpop.f32.mrf.mxu0  ;;  %v771_v15 = vadd.f32 %v763_v29, %v673_v2 }
 0x1ab   : > { %v765_v31 = vpop.f32.mrf.mxu1  ;;  %v769_v4 = vadd.f32 %v722_v30, %v671_v9 }
 0x1ac   : > { %v724_v32 = vpop.f32.mrf.mxu0 }
 0x1ad   : > { %v766_v33 = vpop.f32.mrf.mxu1 }
 0x1ae   : > { %v725_v34 = vpop.f32.mrf.mxu0 }
 0x1af   : > { %v858_v35 = vpop.f32.mrf.mxu1 }
 0x1b0   : > { %v817_v36 = vpop.f32.mrf.mxu0  ;;  %v867_v62 = vadd.f32 %v858_v35, %v770_v10 }
 0x1b1   : > { %v860_v37 = vpop.f32.mrf.mxu1  ;;  %v865_v7 = vadd.f32 %v817_v36, %v768_v61 }
 0x1b2   : > { %v819_v38 = vpop.f32.mrf.mxu0  ;;  %v868_v5 = vadd.f32 %v860_v37, %v771_v15  ;;  %v1173_v37 = vpop.permute.xlu0 %1172 }
 0x1b3   : > { %v862_v39 = vpop.f32.mrf.mxu1  ;;  %v866_v11 = vadd.f32 %v819_v38, %v769_v4 }
 0x1b4   : > { %v821_v40 = vpop.f32.mrf.mxu0 }
 0x1b5   : > { %v863_v41 = vpop.f32.mrf.mxu1 }
 0x1b6   : > { %v822_v42 = vpop.f32.mrf.mxu0 }
 0x1b7   : > { %v961_v43 = vpop.f32.mrf.mxu1 }
 0x1b8   : > { %v920_v44 = vpop.f32.mrf.mxu0  ;;  %v970_v13 = vadd.f32 %v961_v43, %v867_v62 }
 0x1b9   : > { %v963_v45 = vpop.f32.mrf.mxu1  ;;  %v968_v17 = vadd.f32 %v920_v44, %v865_v7 }
 0x1ba   : > { %v922_v46 = vpop.f32.mrf.mxu0  ;;  %v971_v14 = vadd.f32 %v963_v45, %v868_v5 }
 0x1bb   : > { %v965_v47 = vpop.f32.mrf.mxu1  ;;  %v969_v18 = vadd.f32 %v922_v46, %v866_v11 }
 0x1bc   : > { %v924_v50 = vpop.f32.mrf.mxu0 }
 0x1bd   : > { %v966_v53 = vpop.f32.mrf.mxu1 }
 0x1be   : > { %v925_v56 = vpop.f32.mrf.mxu0 }
 0x1bf   : > { %v1058_v63 = vpop.f32.mrf.mxu1 }
 0x1c0   : > { %v1017_v3 = vpop.f32.mrf.mxu0  ;;  %v1067_v20 = vadd.f32 %v1058_v63, %v970_v13 }
 0x1c1   : > { %v1060_v0 = vpop.f32.mrf.mxu1  ;;  %v1065_v23 = vadd.f32 %v1017_v3, %v968_v17 }
 0x1c2   : > { %v1019_v59 = vpop.f32.mrf.mxu0  ;;  %v1068_v21 = vadd.f32 %v1060_v0, %v971_v14 }
 0x1c3   : > { %v1062_v60 = vpop.f32.mrf.mxu1  ;;  %v1066_v24 = vadd.f32 %v1019_v59, %v969_v18 }
 0x1c4   : > { %v1021_v6 = vpop.f32.mrf.mxu0 }
 0x1c5   : > { %v1063_v12 = vpop.f32.mrf.mxu1 }
 0x1c6   : > { %v1022_v16 = vpop.f32.mrf.mxu0 }
 0x1c7   : > { %v1155_v19 = vpop.f32.mrf.mxu1 }
 0x1c8   : > { %v1114_v22 = vpop.f32.mrf.mxu0  ;;  %v1164_v26 = vadd.f32 %v1155_v19, %v1067_v20 }
 0x1c9   : > { %v1157_v25 = vpop.f32.mrf.mxu1  ;;  %v1162_v29 = vadd.f32 %v1114_v22, %v1065_v23 }
 0x1ca   : > { %v1116_v27 = vpop.f32.mrf.mxu0  ;;  %v1165_v28 = vadd.f32 %v1157_v25, %v1068_v21 }
 0x1cb   : > { %v1163_v30 = vadd.f32 %v1116_v27, %v1066_v24  ;;  %v1159_v31 = vpop.f32.mrf.mxu1 }
 0x1cc   : > { %v1167_v32 = vmax.f32 %v1164_v26, %v1165_v28  ;;  %v1118_v33 = vpop.f32.mrf.mxu0 }
 0x1cd   : > { %v1166_v34 = vmax.f32 %v1162_v29, %v1163_v30  ;;  %v1160_v35 = vpop.f32.mrf.mxu1 }
 0x1ce   : > { %v1119_v36 = vpop.f32.mrf.mxu0 }
 0x1cf   : > { %v1168_v38 = vmax.f32 %v1166_v34, %v1167_v32 }
 0x1d1   : > { %v1175_v39 = vadd.f32 %v1173_v37, %v1168_v38 }
 0x1d3   : > { %v1176_v40 = vmax.f32 %v1175_v39, 0.0 }
 0x1d5   : > { %1177 = vst [vmem:[%s203_s4] sm:$0xff] %v1176_v40 }
 0x1d6   : > { %1479 = shalt.err (!%p1476_p0)
}
 0x1d7   : > { %s1480_s29 = scalar_lea.hbm %s1190_s10, 128  ;;  %s1484_s20 = scalar_lea.hbm %s1818_s3, 256 }
 0x1d8   : > { %p1481_p5 = scmp.ne.s32.totalorder %s1190_s10, %s1480_s29  ;;  %p1485_p4 = scmp.lt.s32.totalorder %s1190_s10, %s1818_s3 }
 0x1d9   : > { %p1486_p6 = scmp.lt.s32.totalorder %s1484_s20, %s1480_s29 }
 0x1da   : > { %p1482_p9 = pnand %p1481_p5, %p1834_p11 }
 0x1db   : > { %p1487_p8 = por %p1486_p6, %p1485_p4 }
 0x1dc   : > { %p1483_p1 = pneg %p1482_p9 }
 0x1de   : > { %p1488_p3 = pnand %p1487_p8, %p1483_p1 }
 0x1e0   : > { %1491 = shalt.err (!%p1488_p3)
}
 0x1e1   : > { %1336 = dma.vmem_to_hbm [thread:$0]  (%p1834_p11), %s1193_s7, 128, %s1190_s10, %s1179_s11  }
 0x1e2 PF: > { %s1204_s23 = sand.u32 1, %s1522_s12   ;;  %p1835_p7 = scmp.ne.s32.totalorder %s1824_s19, 0 }
 0x1e3   : > { %p1836_p12 = scmp.ge.s32.totalorder %s1534_s15, 2  ;;  %s1205_s25 = scalar_lea.sflag [#allocation4], %s1204_s23 }
 0x1e5   : > { %p1347_p10 = pnand %p1836_p12, %p1835_p7 }
 0x1e7   : > { %p1348_p2 = pneg %p1347_p10 }
 0x1e9   : > { %1517 = dma.done.wait (%p1348_p2), %s1205_s25, 128  }
 0x1ea   : > { %1519 = vsyncadd (%p1348_p2), %s1205_s25, 4294967168  ;;  %p17_p13 = scmp.ge.s32.totalorder %s1621_s24, 4   ;;  %s1837_s12 = smov %s1526_s13 }
 0x1eb   : > { %s1838_s13 = smov %s1530_s14  ;;  %s1839_s14 = smov %s1638_s5 }
 0x1ec   : > { %s1840_s15 = smov %s1621_s24  ;;  %19 = sbr.rel (!%p17_p13) target bundleno = 6 (0x6), region = 92 }
 0x1f1   :  { %1210 = vsyncpa [#allocation3], 1 }
 0x1f2   :  { %1212 = vsyncpa [#allocation3 + $0x1], 1 }
 0x1f3   :  { %1213 = vsyncpa [#allocation6], 1 }
 0x1f4   :  { %1214 = vsyncpa [#allocation4], 1 }
 0x1f5   :  { %1216 = vsyncpa [#allocation4 + $0x1], 1 }

</bundles_post_ra>
